<compile_context>
chip_gen: v5e
topology: v5e:2x2
jax: 0.10.0
libtpu: 0.0.40
codegen_flags: <defaults>
</compile_context>

<pallas_src>
import math

import jax
import jax.numpy as jnp
import numpy as np
from jax import lax
from jax.experimental import pallas as pl
from jax.experimental.pallas import tpu as pltpu


def _top_k_count(L, factor):
    return min(L, max(1, int(factor * math.log(L))))


def autocorrelation_forward(queries, keys, values, *, factor=1,
                            output_attention=False, corr_dtype=jnp.bfloat16):
    """Forward pass of Autoformer AutoCorrelation (inference aggregation).

    corr_dtype: dtype used for the correlation Gram matmul inputs (bf16 by default:
    mean_corr only feeds top-k + softmax).  Pass jnp.float32 for bit-faithful
    correlation scores.  Accumulation is always f32.
    """
    B, L, H, E = queries.shape
    _, S, _, D = values.shape
    N = H * E
    M = H * D
    f32 = jnp.float32

    # pad / truncate keys and values to length L (matches the PyTorch forward)
    if L > S:
        values = jnp.concatenate(
            [values, jnp.zeros((B, L - S, H, D), values.dtype)], axis=1)
        keys = jnp.concatenate(
            [keys, jnp.zeros((B, L - S, H, E), keys.dtype)], axis=1)
    else:
        values = values[:, :L]
        keys = keys[:, :L]

    nbits = max(1, (L - 1).bit_length())
    inv_n = 1.0 / float(N)

    gdt = corr_dtype if corr_dtype is not None else queries.dtype
    # time-major views: plain reshapes, NO HBM transposes.
    q2 = queries.reshape(B, L, N).astype(gdt)      # [B, L, N]
    k2 = keys.reshape(B, L, N).astype(gdt)         # [B, L, N]
    v2 = values.reshape(B, L, M)                   # [B, L, M] natural layout

    # group-fold parameters for the circular-diagonal reduction
    if L % 8 == 0:
        gs = 8
        full_bits = min(3, nbits)
        rem_rows = L // gs
        rem_bits = max(0, (rem_rows - 1).bit_length())
    else:
        gs = 1
        full_bits = nbits
        rem_rows = L
        rem_bits = 0

    # ------------------------------------------------------------------------
    # Kernel 1: (H,E)-mean circular cross-correlation, one MXU Gram matmul per batch.
    #   G[t, l'] = sum_n k[n, t] * q[n, l']   (NT matmul of the time-major tiles)
    #   mean_corr[tau] = (1/N) * sum_t G[t, (t+tau)%L]
    # Diagonals are summed by skewing row t left by t: bits 0..2 via static lane
    # rolls + selects on [L,L], then groups of 8 rows are folded with one tiny MXU
    # matmul and the remaining bits run on the [L/8, L] matrix.
    # ------------------------------------------------------------------------
    def _mean_corr_kernel(k_ref, q_ref, out_ref):
        kt = k_ref[0]                                             # [L, N] rows = key time
        qt = q_ref[0]                                             # [L, N] rows = query time
        G = lax.dot_general(kt, qt, (((1,), (1,)), ((), ())),
                            preferred_element_type=f32)           # [L, L]
        row = lax.broadcasted_iota(jnp.int32, (L, L), 0)
        Hm = G
        for j in range(full_bits):                                # skew low bits on full matrix
            amt = 1 << j
            shift = (L - amt) % L
            if shift:
                cand = pltpu.roll(Hm, shift=shift, axis=1)        # left-roll by amt
                Hm = jnp.where((row & amt) != 0, cand, Hm)
        if gs > 1:
            # fold groups of gs consecutive rows with one tiny MXU matmul
            gr = lax.broadcasted_iota(jnp.int32, (rem_rows, L), 0)
            gc = lax.broadcasted_iota(jnp.int32, (rem_rows, L), 1)
            sel = jnp.logical_and(gc >= gr * gs, gc < gr * gs + gs)
            Sm = jnp.where(sel, 1.0, 0.0).astype(f32)             # [L/gs, L] 0/1
            Hm = jnp.dot(Sm, Hm, preferred_element_type=f32)      # [L/gs, L]
            for jj in range(rem_bits):                            # remaining bits on reduced matrix
                amt = gs << jj
                shift = (L - amt) % L
                if shift:
                    cand = pltpu.roll(Hm, shift=shift, axis=1)
                    Hm = jnp.where((gr & (1 << jj)) != 0, cand, Hm)
        # column sums == N * mean_corr
        out_ref[0] = jnp.sum(Hm, axis=0, keepdims=True) * inv_n   # [1, L]

    # Full correlation kernel (only used for output_attention=True; not exercised
    # in the default path).  Accumulates row-wise (lane-dense, N on lanes) with a
    # fori_loop over tau + a dynamic sublane roll.
    def _full_corr_kernel(q_ref, k_ref, corr_ref):
        q = q_ref[0].astype(f32)                                  # [L, N]
        k = k_ref[0].astype(f32)

        def body(tau, carry):
            shift = jnp.where(tau == 0, 0, L - tau)
            rolled = pltpu.roll(q, shift=shift, axis=0)           # rolled[l, n] = q[(l+tau)%L, n]
            corr_ref[0, pl.ds(tau, 1), :] = jnp.sum(rolled * k, axis=0, keepdims=True)
            return carry

        lax.fori_loop(0, L, body, 0)

    # conditional VMEM-limit bump for long sequences (unblocked [L,L] intermediates)
    in_bytes = 2 * 2 * L * N * jnp.dtype(gdt).itemsize
    tmp_bytes = 6 * L * L * 4
    est1 = in_bytes + tmp_bytes
    vmem1 = None
    if est1 > 12 * 1024 * 1024:
        vmem1 = int(min(2 * est1, 64 * 1024 * 1024))

    if output_attention:
        corrT = pl.pallas_call(
            _full_corr_kernel,
            out_shape=jax.ShapeDtypeStruct((B, L, N), f32),
            grid=(B,),
            in_specs=[
                pl.BlockSpec((1, L, N), lambda b: (b, 0, 0)),
                pl.BlockSpec((1, L, N), lambda b: (b, 0, 0)),
            ],
            out_specs=pl.BlockSpec((1, L, N), lambda b: (b, 0, 0)),
            compiler_params=pltpu.CompilerParams(
                dimension_semantics=("parallel",), vmem_limit_bytes=vmem1),
        )(q2, k2)                                                  # [B, L, N]
        mean_corr = jnp.mean(corrT, axis=-1)                       # [B, L]
        attn_out = corrT.reshape(B, L, H, E)                       # == corr.permute(0,3,1,2)
    else:
        attn_out = None
        mean3 = pl.pallas_call(
            _mean_corr_kernel,
            out_shape=jax.ShapeDtypeStruct((B, 1, L), f32),
            grid=(B,),
            in_specs=[
                pl.BlockSpec((1, L, N), lambda b: (b, 0, 0)),      # keys  (time-major)
                pl.BlockSpec((1, L, N), lambda b: (b, 0, 0)),      # query (time-major)
            ],
            out_specs=pl.BlockSpec((1, 1, L), lambda b: (b, 0, 0)),
            compiler_params=pltpu.CompilerParams(
                dimension_semantics=("parallel",), vmem_limit_bytes=vmem1),
        )(k2, q2)
        mean_corr = mean3.reshape(B, L)

    # ------------------ top-k delays + softmax weights (tiny, glue JAX) -------------
    top_k = _top_k_count(L, factor)
    K = top_k
    topk_vals, topk_idx = lax.top_k(mean_corr, top_k)              # [B, K]
    w = jax.nn.softmax(topk_vals, axis=-1).astype(f32)             # [B, K]

    # ------------------------------------------------------------------------
    # Kernel 2: time-delay aggregation in the natural [B, L, M] layout.
    #   V[b, l, m] = sum_i w[b,i] * v[b, (l + delay_i) % L, m]
    # Build a [L, L] aggregation matrix A[l, l'] = sum_i w_i * [(l'-l) mod L == d_i]
    # from SMEM scalars and do one MXU matmul A @ v_block.  Output is lane-dense
    # (M on lanes) and written in values.dtype; accumulation is f32.
    # On v7x a second parallel grid axis over M chunks can feed the 2nd TensorCore;
    # kept single-axis here (batch axis already provides megacore parallelism).
    # ------------------------------------------------------------------------
    def _agg_kernel(idx_sref, w_sref, v_ref, o_ref):
        b = pl.program_id(0)
        rowi = lax.broadcasted_iota(jnp.int32, (L, L), 0)          # output time l
        coli = lax.broadcasted_iota(jnp.int32, (L, L), 1)          # source time l'
        d0 = coli - rowi
        diff = jnp.where(d0 < 0, d0 + L, d0)                       # (l' - l) mod L
        A = jnp.zeros((L, L), f32)
        for i in range(K):                                         # K = factor*log(L), small & static
            d = idx_sref[b, i]                                     # int32 scalar (SMEM)
            wi = w_sref[b, i]                                      # f32 scalar  (SMEM)
            A = A + jnp.where(diff == d, wi, 0.0)
        v = v_ref[0].astype(f32)                                   # [L, M]
        o_ref[0] = jnp.dot(A, v, preferred_element_type=f32).astype(o_ref.dtype)

    grid_spec = pltpu.PrefetchScalarGridSpec(
        num_scalar_prefetch=2,
        grid=(B,),
        in_specs=[pl.BlockSpec((1, L, M), lambda b, idx, wts: (b, 0, 0))],
        out_specs=pl.BlockSpec((1, L, M), lambda b, idx, wts: (b, 0, 0)),
    )
    V2 = pl.pallas_call(
        _agg_kernel,
        out_shape=jax.ShapeDtypeStruct((B, L, M), values.dtype),
        grid_spec=grid_spec,
        compiler_params=pltpu.CompilerParams(
            dimension_semantics=("parallel",)),
    )(topk_idx.astype(jnp.int32), w, v2)

    V = V2.reshape(B, L, H, D)                                     # no transpose needed

    if output_attention:
        return V, attn_out
    return V, None


# ----------------------------------------------------------------------------
# Pure-JAX reference (mirrors the PyTorch FFT + inference aggregation path)
# ----------------------------------------------------------------------------
def _reference_forward(queries, keys, values, *, factor=1):
    B, L, H, E = queries.shape
    _, S, _, D = values.shape
    if L > S:
        values = jnp.concatenate(
            [values, jnp.zeros((B, L - S, H, D), values.dtype)], axis=1)
        keys = jnp.concatenate(
            [keys, jnp.zeros((B, L - S, H, E), keys.dtype)], axis=1)
    else:
        values = values[:, :L]
        keys = keys[:, :L]
    qp = jnp.transpose(queries, (0, 2, 3, 1))
    kp = jnp.transpose(keys, (0, 2, 3, 1))
    vp = jnp.transpose(values, (0, 2, 3, 1)).astype(jnp.float32)   # [B,H,D,L]
    corr = jnp.fft.irfft(jnp.fft.rfft(qp, axis=-1) *
                         jnp.conj(jnp.fft.rfft(kp, axis=-1)), n=L, axis=-1)
    mean_corr = jnp.mean(corr, axis=(1, 2))
    top_k = _top_k_count(L, factor)
    topk_vals, topk_idx = lax.top_k(mean_corr, top_k)
    w = jax.nn.softmax(topk_vals, axis=-1)
    agg = jnp.zeros_like(vp)
    for i in range(top_k):
        idx = (jnp.arange(L)[None, :] + topk_idx[:, i][:, None]) % L   # [B, L]
        idx_full = jnp.broadcast_to(idx[:, None, None, :], vp.shape)
        rolled = jnp.take_along_axis(vp, idx_full, axis=-1)
        agg = agg + rolled * w[:, i][:, None, None, None]
    return jnp.transpose(agg, (0, 3, 1, 2))                            # [B,L,H,D]


if __name__ == "__main__":
    B, L, S, H, E, D = 2, 16, 16, 4, 8, 8
    key = jax.random.PRNGKey(0)
    kq, kk, kv = jax.random.split(key, 3)
    queries = jax.random.normal(kq, (B, L, H, E), jnp.float32)
    keys = jax.random.normal(kk, (B, S, H, E), jnp.float32)
    values = jax.random.normal(kv, (B, S, H, D), jnp.float32)

    # Strict check: full-f32 correlation path vs FFT reference.
    V, attn = autocorrelation_forward(queries, keys, values, factor=1,
                                      output_attention=False,
                                      corr_dtype=jnp.float32)
    V = jax.block_until_ready(V)
    V_ref = jax.block_until_ready(
        _reference_forward(queries, keys, values, factor=1))

    assert V.shape == (B, L, H, D), V.shape
    assert attn is None
    np.testing.assert_allclose(np.asarray(V), np.asarray(V_ref),
                               rtol=2e-4, atol=2e-4)

    # Default fast path (bf16 Gram matmul): compile/run + shape/finiteness sanity.
    # (top-k/softmax inputs are bf16-rounded, so no tight numerical assert here.)
    V_fast, _ = autocorrelation_forward(queries, keys, values, factor=1)
    V_fast = jax.block_until_ready(V_fast)
    assert V_fast.shape == (B, L, H, D), V_fast.shape
    assert bool(jnp.all(jnp.isfinite(V_fast.astype(jnp.float32))))

    print("KERNEL_OK")
</pallas_src>

<mosaic_0001>
module attributes {stable_mosaic.version = 11 : i64} {
  func.func @_mean_corr_kernel(%arg0: i32, %arg1: memref<1x16x32xf32, #tpu.memory_space<vmem>>, %arg2: memref<1x16x32xf32, #tpu.memory_space<vmem>>, %arg3: memref<1x1x16xf32, #tpu.memory_space<vmem>>) attributes {dimension_semantics = [#tpu.dimension_semantics<parallel>], iteration_bounds = array<i64: 2>, scalar_prefetch = 0 : i64, scratch_operands = 0 : i64, tpu.core_type = #tpu.core_type<tc>, window_params = [{transform_indices = @transform_0, window_bounds = array<i64: 1, 16, 32>}, {transform_indices = @transform_1, window_bounds = array<i64: 1, 16, 32>}, {transform_indices = @transform_2, window_bounds = array<i64: 1, 1, 16>}]} {
    %c0 = arith.constant 0 : index
    %c0_0 = arith.constant 0 : index
    %c0_1 = arith.constant 0 : index
    %0 = vector.load %arg1[%c0, %c0_0, %c0_1] : memref<1x16x32xf32, #tpu.memory_space<vmem>>, vector<1x16x32xf32>
    %1 = vector.shape_cast %0 : vector<1x16x32xf32> to vector<16x32xf32>
    %c0_2 = arith.constant 0 : index
    %c0_3 = arith.constant 0 : index
    %c0_4 = arith.constant 0 : index
    %2 = vector.load %arg2[%c0_2, %c0_3, %c0_4] : memref<1x16x32xf32, #tpu.memory_space<vmem>>, vector<1x16x32xf32>
    %3 = vector.shape_cast %2 : vector<1x16x32xf32> to vector<16x32xf32>
    %cst = arith.constant dense<0.000000e+00> : vector<16x16xf32>
    %4 = tpu.matmul %1, %3, %cst {dimension_numbers = #tpu.dot_dimension_numbers<[1], [1], [0], [0], [0, 0, 1, 0], [], []>} : vector<16x32xf32>, vector<16x32xf32>, vector<16x16xf32> -> vector<16x16xf32>
    %5 = tpu.iota {dimensions = array<i32: 0>} : vector<16x16xi32>
    %c15_i32 = arith.constant 15 : i32
    %6 = tpu.dynamic_rotate %4 by %c15_i32 dim 1 : vector<16x16xf32>, i32 -> vector<16x16xf32>
    %c1_i32 = arith.constant 1 : i32
    %7 = vector.broadcast %c1_i32 : i32 to vector<16x16xi32>
    %8 = arith.andi %5, %7 : vector<16x16xi32>
    %c0_i32 = arith.constant 0 : i32
    %9 = vector.broadcast %c0_i32 : i32 to vector<16x16xi32>
    %10 = arith.cmpi ne, %8, %9 : vector<16x16xi32>
    %11 = arith.select %10, %6, %4 : vector<16x16xi1>, vector<16x16xf32>
    %c14_i32 = arith.constant 14 : i32
    %12 = tpu.dynamic_rotate %11 by %c14_i32 dim 1 : vector<16x16xf32>, i32 -> vector<16x16xf32>
    %c2_i32 = arith.constant 2 : i32
    %13 = vector.broadcast %c2_i32 : i32 to vector<16x16xi32>
    %14 = arith.andi %5, %13 : vector<16x16xi32>
    %c0_i32_5 = arith.constant 0 : i32
    %15 = vector.broadcast %c0_i32_5 : i32 to vector<16x16xi32>
    %16 = arith.cmpi ne, %14, %15 : vector<16x16xi32>
    %17 = arith.select %16, %12, %11 : vector<16x16xi1>, vector<16x16xf32>
    %c12_i32 = arith.constant 12 : i32
    %18 = tpu.dynamic_rotate %17 by %c12_i32 dim 1 : vector<16x16xf32>, i32 -> vector<16x16xf32>
    %c4_i32 = arith.constant 4 : i32
    %19 = vector.broadcast %c4_i32 : i32 to vector<16x16xi32>
    %20 = arith.andi %5, %19 : vector<16x16xi32>
    %c0_i32_6 = arith.constant 0 : i32
    %21 = vector.broadcast %c0_i32_6 : i32 to vector<16x16xi32>
    %22 = arith.cmpi ne, %20, %21 : vector<16x16xi32>
    %23 = arith.select %22, %18, %17 : vector<16x16xi1>, vector<16x16xf32>
    %24 = tpu.iota {dimensions = array<i32: 0>} : vector<2x16xi32>
    %25 = tpu.iota {dimensions = array<i32: 1>} : vector<2x16xi32>
    %c8_i32 = arith.constant 8 : i32
    %26 = vector.broadcast %c8_i32 : i32 to vector<2x16xi32>
    %27 = arith.muli %24, %26 : vector<2x16xi32>
    %28 = arith.cmpi sge, %25, %27 : vector<2x16xi32>
    %c8_i32_7 = arith.constant 8 : i32
    %29 = vector.broadcast %c8_i32_7 : i32 to vector<2x16xi32>
    %30 = arith.muli %24, %29 : vector<2x16xi32>
    %c8_i32_8 = arith.constant 8 : i32
    %31 = vector.broadcast %c8_i32_8 : i32 to vector<2x16xi32>
    %32 = arith.addi %30, %31 : vector<2x16xi32>
    %33 = arith.cmpi slt, %25, %32 : vector<2x16xi32>
    %34 = arith.andi %28, %33 : vector<2x16xi1>
    %cst_9 = arith.constant 1.000000e+00 : f32
    %cst_10 = arith.constant 0.000000e+00 : f32
    %35 = vector.broadcast %cst_9 : f32 to vector<2x16xf32>
    %36 = vector.broadcast %cst_10 : f32 to vector<2x16xf32>
    %37 = arith.select %34, %35, %36 : vector<2x16xi1>, vector<2x16xf32>
    %cst_11 = arith.constant dense<0.000000e+00> : vector<2x16xf32>
    %38 = tpu.matmul %37, %23, %cst_11 {dimension_numbers = #tpu.dot_dimension_numbers<[1], [0], [0], [1], [0, 0, 1, 1], [], []>} : vector<2x16xf32>, vector<16x16xf32>, vector<2x16xf32> -> vector<2x16xf32>
    %c8_i32_12 = arith.constant 8 : i32
    %39 = tpu.dynamic_rotate %38 by %c8_i32_12 dim 1 : vector<2x16xf32>, i32 -> vector<2x16xf32>
    %c1_i32_13 = arith.constant 1 : i32
    %40 = vector.broadcast %c1_i32_13 : i32 to vector<2x16xi32>
    %41 = arith.andi %24, %40 : vector<2x16xi32>
    %c0_i32_14 = arith.constant 0 : i32
    %42 = vector.broadcast %c0_i32_14 : i32 to vector<2x16xi32>
    %43 = arith.cmpi ne, %41, %42 : vector<2x16xi32>
    %44 = arith.select %43, %39, %38 : vector<2x16xi1>, vector<2x16xf32>
    %cst_15 = arith.constant dense<0.000000e+00> : vector<16xf32>
    %45 = vector.multi_reduction <add>, %44, %cst_15 [0] : vector<2x16xf32> to vector<16xf32>
    %46 = vector.shape_cast %45 : vector<16xf32> to vector<1x16xf32>
    %cst_16 = arith.constant 3.125000e-02 : f32
    %47 = vector.broadcast %cst_16 : f32 to vector<1x16xf32>
    %48 = arith.mulf %46, %47 : vector<1x16xf32>
    %c0_17 = arith.constant 0 : index
    %c0_18 = arith.constant 0 : index
    %c0_19 = arith.constant 0 : index
    %49 = vector.load %arg3[%c0_17, %c0_18, %c0_19] : memref<1x1x16xf32, #tpu.memory_space<vmem>>, vector<1x1x16xf32>
    %50 = vector.shape_cast %49 : vector<1x1x16xf32> to vector<1x16xf32>
    %51 = vector.shape_cast %48 : vector<1x16xf32> to vector<1x1x16xf32>
    tpu.vector_store %arg3[%c0_17, %c0_18, %c0_19], %51 {strides = array<i32>} : memref<1x1x16xf32, #tpu.memory_space<vmem>>, vector<1x1x16xf32>,
    return
  }
  func.func @transform_0(%arg0: i32) -> (i32, i32, i32) {
    %c0_i32 = arith.constant 0 : i32
    %c0_i32_0 = arith.constant 0 : i32
    %c0_i32_1 = arith.constant 0 : i32
    return %arg0, %c0_i32, %c0_i32_0 : i32, i32, i32
  }
  func.func @transform_1(%arg0: i32) -> (i32, i32, i32) {
    %c0_i32 = arith.constant 0 : i32
    %c0_i32_0 = arith.constant 0 : i32
    %c0_i32_1 = arith.constant 0 : i32
    return %arg0, %c0_i32, %c0_i32_0 : i32, i32, i32
  }
  func.func @transform_2(%arg0: i32) -> (i32, i32, i32) {
    %c0_i32 = arith.constant 0 : i32
    %c0_i32_0 = arith.constant 0 : i32
    %c0_i32_1 = arith.constant 0 : i32
    return %arg0, %c0_i32, %c0_i32_0 : i32, i32, i32
  }
}

</mosaic_0001>

<bundles_post_ra>
// kernel: tpu_custom_call.1
= control target key start
LH: loop header
LB: loop body
LE: loop exit
PB: predicated region body
PF: predicated region fallthrough
CT: control target
= control target key end

     0   :  { %7 = vsyncpa [#allocation3], 0  ;;  %s1023_s0 = inlined_call_operand.hbm [shape: f32[2,16,32], index: 0, kind: input, shape index: {}]   ;;  %s1024_s1 = inlined_call_operand.hbm [shape: f32[2,16,32], index: 1, kind: input, shape index: {}]   ;;  %s1025_s2 = inlined_call_operand.hbm [shape: f32[2,1,16], index: 2, kind: output, shape index: {}]  }
   0x1   :  { %9 = vsyncpa [#allocation3 + $0x1], 0 }
   0x2   :  { %10 = vsyncpa [#allocation6], 0 }
   0x3   :  { %12 = vsyncpa [#allocation6 + $0x1], 0 }
   0x4   :  { %13 = vsyncpa [#allocation4], 0 }
   0x5   :  { %15 = vsyncpa [#allocation4 + $0x1], 0  ;;  %s810_s9 = smov 0   ;;  %s812_s10 = smov 0  }
   0x6   :  { %s814_s11 = smov 0   ;;  %s816_s12 = smov 0  }
   0x7 LB: > { %s831_s13 = sadd.s32 4294967295, %s782_s12   ;;  %s507_s14 = sadd.s32 4294967294, %s782_s12   ;;  %s782_s12 = sphi %s816_s12, %s1038_s12   ;;  %s778_s11 = sphi %s814_s11, %s1037_s11   ;;  %s774_s10 = sphi %s812_s10, %s1036_s10   ;;  %s770_s9 = sphi %s810_s9, %s1035_s9  }
   0x8   : > { %s835_s15 = sadd.s32 1, %s782_s12   ;;  %s28_s16 = sadd.s32 1, %s778_s11 }
   0x9   : > { %s25_s17 = ssub.s32 %s782_s12, %s835_s15  ;;  %p35_p0 = scmp.ne.s32.totalorder %s778_s11, %s774_s10 }
   0xa   : > { %p26_p1 = scmp.eq.s32.totalorder %s25_s17, 0  ;;  %p36_p2 = scmp.eq.s32.totalorder %s782_s12, 0 }
   0xb   : > { %p41_p3 = scmp.ne.s32.totalorder %s774_s10, %s770_s9  ;;  %p42_p4 = scmp.eq.s32.totalorder %s831_s13, 0 }
   0xc   : > { %s847_s18 = scalar_select %p26_p1, %s778_s11, %s28_s16  }
   0xd   : > { %p849_p5 = por %p36_p2, %p35_p0  ;;  %p853_p6 = por %p42_p4, %p41_p3 }
   0xe   : > { %p91_p7 = scmp.eq.s32.totalorder %s831_s13, 1  ;;  %p97_p8 = scmp.eq.s32.totalorder %s507_s14, 1 }
   0xf   : > { %p547_p10 = scmp.lt.s32.totalorder %s782_s12, 2  ;;  %s869_s23 = sand.u32 1, %s778_s11  }
  0x10   : > { %p860_p11 = por %p91_p7, %p35_p0  ;;  %p864_p12 = por %p97_p8, %p41_p3 }
  0x11   : > { %s526_s24 = sshll.u32 %s782_s12, 4  ;;  %s510_s25 = sshll.u32 %s869_s23, 4 }
  0x12   : > { %s126_s28 = scalar_lea.hbm %s1023_s0, %s526_s24  ;;  %s121_s30 = scalar_lea.vmem [#allocation2], %s510_s25 }
  0x13   : > { %s127_s29 = sshll.u32 %s126_s28, 4  ;;  %s129_s3 = sshll.u32 %s121_s30, 4  ;;  %s128_s29 = int_to_ptr.hbm [resolvable:$true] %s127_s29  ;;  %s130_s3 = int_to_ptr.vmem [resolvable:$true] %s129_s3 }
  0x14   : > { %p882_p13 = pnand %p547_p10, %p849_p5  ;;  %p516_p0 = scmp.ge.s32.totalorder %s782_s12, 1 }
  0x15   : > { %p159_p1 = scmp.lt.s32.totalorder %s782_s12, 3  ;;  %s118_s5 = scalar_lea.sflag [#allocation3], %s869_s23 }
  0x16   : > { %s652_s6 = sshra.s32 %s128_s29, 4  ;;  %p656_p3 = pneg %p882_p13  ;;  %s653_s6 = int_to_ptr.hbm [resolvable:$true] %s652_s6 }
  0x17   : > { %s654_s7 = scalar_lea.hbm %s653_s6, 16  ;;  %s659_s16 = scalar_lea.hbm %s1023_s0, 32 }
  0x18   : > { %p655_p2 = scmp.ne.s32.totalorder %s653_s6, %s654_s7  ;;  %p660_p5 = scmp.lt.s32.totalorder %s653_s6, %s1023_s0 }
  0x19   : > { %p661_p8 = scmp.lt.s32.totalorder %s659_s16, %s654_s7 }
  0x1a   : > { %p657_p4 = pnand %p656_p3, %p655_p2 }
  0x1b   : > { %p662_p10 = por %p661_p8, %p660_p5 }
  0x1c   : > { %p658_p7 = pneg %p657_p4 }
  0x1e   : > { %p663_p9 = pnand %p662_p10, %p658_p7 }
  0x20   : > { %666 = shalt.err (!%p663_p9)
}
  0x21   : > { %s784_s26 = smov 128   ;;  %s785_s27 = smov 8  }
  0x22   : > { %539 = dma.hbm_to_vmem [thread:$0]  (!%p882_p13), %s128_s29, 256, %s130_s3, %s118_s5, %s784_s26, %s784_s26, %s785_s27  }
  0x23   : > { %p906_p2 = pnand %p516_p0, %p159_p1  ;;  %s148_s7 = scalar_lea.hbm %s1024_s1, %s526_s24 }
  0x24   : > { %s149_s8 = sshll.u32 %s148_s7, 4  ;;  %s143_s14 = scalar_lea.vmem [#allocation5], %s510_s25  ;;  %s150_s8 = int_to_ptr.hbm [resolvable:$true] %s149_s8 }
  0x25   : > { %s151_s16 = sshll.u32 %s143_s14, 4  ;;  %s140_s17 = scalar_lea.sflag [#allocation6], %s869_s23  ;;  %s152_s16 = int_to_ptr.vmem [resolvable:$true] %s151_s16 }
  0x26   : > { %s682_s19 = sshra.s32 %s150_s8, 4  ;;  %s689_s30 = scalar_lea.hbm %s1024_s1, 32  ;;  %s683_s19 = int_to_ptr.hbm [resolvable:$true] %s682_s19 }
  0x27   : > { %s684_s29 = scalar_lea.hbm %s683_s19, 16  ;;  %p690_p4 = scmp.lt.s32.totalorder %s683_s19, %s1024_s1 }
  0x28   : > { %p685_p9 = scmp.ne.s32.totalorder %s683_s19, %s684_s29  ;;  %p691_p7 = scmp.lt.s32.totalorder %s689_s30, %s684_s29 }
  0x2a   : > { %p687_p0 = pnand %p685_p9, %p656_p3  ;;  %p692_p5 = por %p691_p7, %p690_p4 }
  0x2c   : > { %p688_p1 = pneg %p687_p0 }
  0x2e   : > { %p693_p8 = pnand %p692_p5, %p688_p1 }
  0x30   : > { %696 = shalt.err (!%p693_p8)
}
  0x31   : > { %542 = dma.hbm_to_vmem [thread:$0]  (!%p882_p13), %s150_s8, 256, %s152_s16, %s140_s17, %s784_s26, %s784_s26, %s785_s27  }
  0x32   : > { %163 = sbr.rel (%p906_p2) target bundleno = 1669 (0x685), region = 28  ;;  %s932_s23 = sand.u32 (!%p906_p2), 1, %s774_s10  }
  0x33   : > { %s517_s25 = sshll.u32 (!%p906_p2), %s932_s23, 4  ;;  %s166_s7 = scalar_lea.sflag (!%p906_p2), [#allocation3], %s932_s23 }
  0x34   : > { %s169_s14 = scalar_lea.vmem (!%p906_p2), [#allocation2], %s517_s25 }
  0x37   : > { %757 = dma.done.wait (%p853_p6), %s166_s7, 256  }
  0x38   : > { %759 = vsyncadd (%p853_p6), %s166_s7, 4294967040  ;;  %s176_s4 = scalar_lea.sflag [#allocation6], %s932_s23  ;;  %s179_s26 = scalar_lea.vmem [#allocation5], %s517_s25 }
  0x39   : > { %761 = dma.done.wait (%p853_p6), %s176_s4, 256  }
  0x3a   : > { %763 = vsyncadd (%p853_p6), %s176_s4, 4294967040  ;;  %vm209_vm0 = vcmask 261120   ;;  %v208_v0 = vld [vmem:[%s179_s26 + $0x8] sm:$0xff]  ;;  %v207_v1 = vld [vmem:[%s179_s26] sm:$0xff]  ;;  %s786_s27 = smov 1   ;;  %s787_s28 = smov 16   ;;  %v245_v13 = vlaneseq }
  0x3b   : > { %528 = vmatpush.xpose.msk.msra.mxu2 %vm209_vm0, %v208_v0  ;;  %519 = vmatpush.xpose.msk.msra.mxu0 %vm209_vm0, %v208_v0  ;;  %v206_v2 = vld [vmem:[%s169_s14 + $0x8] sm:$0xff]  ;;  %v205_v3 = vld [vmem:[%s169_s14] sm:$0xff]  ;;  %vm248_vm1 = vcmask 1047680   ;;  %s788_s20 = smov 127   ;;  %s789_s8 = smov 126   ;;  %vm355_vm11 = vcmask 130048  }
  0x3c   : > { %v950_v14 = vshrl.u32 %v245_v13, 7  ;;  %s790_s16 = smov 2   ;;  %s791_s17 = smov 124   ;;  %vm390_vm12 = vcmask 189504   ;;  %vm403_vm13 = vcmask 122880  }
  0x3d   : > { %s793_s19 = smov 8   ;;  %s794_s29 = smov 120  }
  0x3e   : > { %v953_v15 = vadd.s32 8, %v950_v14  ;;  %v261_v16 = vand.u32 1, %v950_v14  ;;  %v295_v39 = vand.u32 2, %v950_v14  ;;  %v327_v61 = vand.u32 4, %v950_v14  ;;  %s414_s30 = scalar_lea.hbm %s1025_s2, %s831_s13  ;;  %s204_s24 = scalar_lea.vmem [#allocation7], %s932_s23 }
  0x3f   : > { %529 = vmatpush.xpose.msk.msra.mxu2 %vm209_vm0, %v207_v1  ;;  %520 = vmatpush.xpose.msk.msra.mxu0 %vm209_vm0, %v207_v1  ;;  %s416_s6 = sshll.u32 %s204_s24, 4  ;;  %s418_s25 = sshll.u32 %s414_s30, 4  ;;  %s417_s6 = int_to_ptr.vmem [resolvable:$true] %s416_s6  ;;  %s419_s25 = int_to_ptr.hbm [resolvable:$true] %s418_s25 }
  0x40   : > { %v262_v17 = vand.u32 1, %v953_v15  ;;  %vm957_vm2 = vcmp.ne.s32.totalorder %v261_v16, 0  ;;  %v296_v40 = vand.u32 2, %v953_v15  ;;  %vm297_vm4 = vcmp.ne.s32.totalorder %v295_v39, 0  ;;  %s406_s7 = scalar_lea.sflag [#allocation4], %s932_s23  ;;  %s726_s14 = sshra.s32 %s419_s25, 4  ;;  %s727_s14 = int_to_ptr.hbm [resolvable:$true] %s726_s14 }
  0x41   : > { %v328_v62 = vand.u32 4, %v953_v15  ;;  %vm329_vm6 = vcmp.ne.s32.totalorder %v327_v61, 0  ;;  %s728_s4 = scalar_lea.hbm %s727_s14, 1  ;;  %s732_s13 = scalar_lea.hbm %s1025_s2, 2 }
  0x42   : > { %522 = vmatmul.msk.f32.vlgmr.msra.gmra.mxu2 %vm209_vm0, %v206_v2  ;;  %521 = vmatmul.msk.f32.vlgmr.msra.gmra.mxu0 %vm209_vm0, %v205_v3  ;;  %vm264_vm3 = vcmp.ne.s32.totalorder %v262_v17, 0  ;;  %vm298_vm5 = vcmp.ne.s32.totalorder %v296_v40, 0  ;;  %p729_p6 = scmp.ne.s32.totalorder %s727_s14, %s728_s4  ;;  %p733_p10 = scmp.lt.s32.totalorder %s727_s14, %s1025_s2 }
  0x43   : > { %vm330_vm7 = vcmp.ne.s32.totalorder %v328_v62, 0  ;;  %p734_p2 = scmp.lt.s32.totalorder %s732_s13, %s728_s4 }
  0x44   : > { %p730_p13 = pnand %p729_p6, %p860_p11 }
  0x45   : > { %p735_p9 = por %p734_p2, %p733_p10 }
  0x46   : > { %p731_p3 = pneg %p730_p13 }
  0x48   : > { %p736_p0 = pnand %p735_p9, %p731_p3 }
  0xbf   : > { %v239_v4 = vpop.f32.mrf.mxu0 }
  0xc5   : > { %v242_v5 = vpop.f32.mrf.mxu2 }
  0xc6   : > { %v602_v6 = vpack.i.bf16 %v239_v4, %v242_v5 }
  0xc8   : > { %603 = vrot.lane.b32.xlu1 %v602_v6, %s786_s27  ;;  %593 = vrot.lane.b32.xlu0 %v602_v6, %s787_s28 }
 0x13a   : > { %v594_v7 = vpop.permute.xlu0 %593  ;;  %v604_v18 = vpop.permute.xlu1 %603 }
 0x13b   : > { %v596_v8 = vunpack.i.h.bf16 %v594_v7  ;;  %v595_v9 = vunpack.i.l.bf16 %v594_v7  ;;  %v606_v23 = vunpack.i.h.bf16 %v604_v18  ;;  %v605_v24 = vunpack.i.l.bf16 %v604_v18 }
 0x13c   : > { %v792_v18 = vmov 0.0  }
 0x13d   : > { %v251_v10 = vsel %vm248_vm1, %v596_v8, %v239_v4  ;;  %v254_v11 = vsel %vm248_vm1, %v595_v9, %v242_v5 }
 0x13e   : > { %v597_v12 = vpack.i.bf16 %v251_v10, %v254_v11  ;;  %v341_v10 = vmul.u32 8, %v950_v14  ;;  %v340_v11 = vand.u32 127, %v245_v13 }
 0x140   : > { %598 = vrot.lane.b32.xlu0 %v597_v12, %s787_s28  ;;  %v343_v12 = vadd.s32 8, %v341_v10  ;;  %vm342_vm8 = vcmp.ge.s32.totalorder %v340_v11, %v341_v10 }
 0x142   : > { %vm344_vm9 = vcmp.lt.s32.totalorder %v340_v11, %v343_v12 }
 0x143   : > { %vm345_vm10 = vmand %vm342_vm8, %vm344_vm9 }
 0x1b2   : > { %v599_v19 = vpop.permute.xlu0 %598 }
 0x1b3   : > { %v601_v20 = vunpack.i.h.bf16 %v599_v19  ;;  %v600_v21 = vunpack.i.l.bf16 %v599_v19  ;;  %v346_v19 = vsel %vm345_vm10, 1.0, %v792_v18 }
 0x1b5   : > { %v259_v25 = vsel %vm248_vm1, %v601_v20, %v239_v4  ;;  %v260_v26 = vsel %vm248_vm1, %v600_v21, %v242_v5 }
 0x1b6   : > { %v273_v27 = vsel %vm957_vm2, %v259_v25, %v606_v23  ;;  %v274_v28 = vsel %vm264_vm3, %v260_v26, %v605_v24 }
 0x1b7   : > { %v622_v29 = vpack.i.bf16 %v273_v27, %v274_v28 }
 0x1b9   : > { %623 = vrot.lane.b32.xlu0 %v622_v29, %s786_s27  ;;  %608 = vrot.lane.b32.xlu1 %v622_v29, %s788_s20 }
 0x22b   : > { %v609_v30 = vpop.permute.xlu1 %608  ;;  %v624_v41 = vpop.permute.xlu0 %623 }
 0x22c   : > { %v611_v31 = vunpack.i.h.bf16 %v609_v30  ;;  %v610_v32 = vunpack.i.l.bf16 %v609_v30  ;;  %613 = vrot.lane.b32.xlu2 %v609_v30, %s787_s28  ;;  %v626_v45 = vunpack.i.h.bf16 %v624_v41  ;;  %v625_v46 = vunpack.i.l.bf16 %v624_v41 }
 0x286   : > { %v614_v33 = vpop.permute.xlu2 %613 }
 0x287   : > { %v616_v34 = vunpack.i.h.bf16 %v614_v33  ;;  %v615_v35 = vunpack.i.l.bf16 %v614_v33 }
 0x289   : > { %v285_v36 = vsel %vm248_vm1, %v616_v34, %v611_v31  ;;  %v288_v37 = vsel %vm248_vm1, %v615_v35, %v610_v32 }
 0x28a   : > { %v617_v38 = vpack.i.bf16 %v285_v36, %v288_v37 }
 0x28c   : > { %618 = vrot.lane.b32.xlu2 %v617_v38, %s787_s28 }
 0x2e6   : > { %v619_v42 = vpop.permute.xlu2 %618 }
 0x2e7   : > { %v621_v43 = vunpack.i.h.bf16 %v619_v42  ;;  %v620_v44 = vunpack.i.l.bf16 %v619_v42 }
 0x2e9   : > { %v293_v47 = vsel %vm248_vm1, %v621_v43, %v611_v31  ;;  %v294_v48 = vsel %vm248_vm1, %v620_v44, %v610_v32 }
 0x2ea   : > { %v305_v49 = vsel %vm297_vm4, %v293_v47, %v626_v45  ;;  %v306_v50 = vsel %vm298_vm5, %v294_v48, %v625_v46 }
 0x2eb   : > { %v627_v51 = vpack.i.bf16 %v305_v49, %v306_v50 }
 0x2ed   : > { %628 = vrot.lane.b32.xlu1 %v627_v51, %s789_s8 }
 0x2f5   : > { %643 = vrot.lane.b32.xlu1 %v627_v51, %s790_s16 }
 0x35f   : > { %v629_v52 = vpop.permute.xlu1 %628 }
 0x360   : > { %v631_v53 = vunpack.i.h.bf16 %v629_v52  ;;  %v630_v54 = vunpack.i.l.bf16 %v629_v52  ;;  %633 = vrot.lane.b32.xlu2 %v629_v52, %s787_s28 }
 0x367   : > { %v644_v63 = vpop.permute.xlu1 %643 }
 0x368   : > { %v646_v3 = vunpack.i.h.bf16 %v644_v63  ;;  %v645_v4 = vunpack.i.l.bf16 %v644_v63 }
 0x3ba   : > { %v634_v55 = vpop.permute.xlu2 %633 }
 0x3bb   : > { %v636_v56 = vunpack.i.h.bf16 %v634_v55  ;;  %v635_v57 = vunpack.i.l.bf16 %v634_v55 }
 0x3bd   : > { %v317_v58 = vsel %vm248_vm1, %v636_v56, %v631_v53  ;;  %v320_v59 = vsel %vm248_vm1, %v635_v57, %v630_v54 }
 0x3be   : > { %v637_v60 = vpack.i.bf16 %v317_v58, %v320_v59 }
 0x3c0   : > { %638 = vrot.lane.b32.xlu0 %v637_v60, %s787_s28 }
 0x432   : > { %v639_v0 = vpop.permute.xlu0 %638 }
 0x433   : > { %v641_v1 = vunpack.i.h.bf16 %v639_v0  ;;  %v640_v2 = vunpack.i.l.bf16 %v639_v0 }
 0x435   : > { %v325_v5 = vsel %vm248_vm1, %v641_v1, %v631_v53  ;;  %v326_v6 = vsel %vm248_vm1, %v640_v2, %v630_v54 }
 0x436   : > { %v337_v7 = vsel %vm329_vm6, %v325_v5, %v646_v3  ;;  %v338_v8 = vsel %vm330_vm7, %v326_v6, %v645_v4 }
 0x437   : > { %v647_v9 = vpack.i.bf16 %v337_v7, %v338_v8 }
 0x439   : > { %648 = vrot.lane.b32.xlu2 %v647_v9, %s791_s17 }
 0x493   : > { %v649_v15 = vpop.permute.xlu2 %648 }
 0x494   : > { %v650_v16 = vunpack.i.l.bf16 %v649_v15  ;;  %v651_v17 = vunpack.i.h.bf16 %v649_v15 }
 0x496   : > { %373 = vmatpush.msra.mxu1 %v650_v16 }
 0x498   : > { %374 = vmatpush.msra.mxu1 %v651_v17 }
 0x499   : > { %523 = vmatmul.msk.f32.vlgmr.msra.gmra.mxu1 %vm355_vm11, %v346_v19 }
 0x516   : > { %v376_v20 = vpop.f32.mrf.mxu1 }
 0x517   : > { %386 = vrot.lane.b32.xlu2 %v376_v20, %s793_s19  ;;  %379 = vrot.lane.b32.xlu0 %v376_v20, %s787_s28 }
 0x571   : > { %v387_v23 = vpop.permute.xlu2 %386 }
 0x589   : > { %v380_v14 = vpop.permute.xlu0 %379 }
 0x58a   : > { %v381_v13 = vsel %vm248_vm1, %v380_v14, %v376_v20 }
 0x58b   : > { %382 = vrot.lane.b32.xlu1 %v381_v13, %s787_s28 }
 0x5fd   : > { %v383_v21 = vpop.permute.xlu1 %382 }
 0x5fe   : > { %v384_v24 = vsel %vm248_vm1, %v383_v21, %v376_v20 }
 0x5ff   : > { %v389_v25 = vsel %vm957_vm2, %v384_v24, %v387_v23 }
 0x600   : > { %v391_v26 = vsel %vm390_vm12, %v389_v25, 0.0 }
 0x601   : > { %v392_v27 = vrot.slane %v391_v26, 4 }
 0x603   : > { %v393_v28 = vadd.f32 %v392_v27, %v391_v26 }
 0x605   : > { %v394_v29 = vrot.slane %v393_v28, 2 }
 0x607   : > { %v395_v30 = vadd.f32 %v394_v29, %v393_v28 }
 0x609   : > { %v396_v31 = vrot.slane %v395_v30, 1 }
 0x60b   : > { %v397_v32 = vadd.f32 %v396_v31, %v395_v30 }
 0x60d   : > { %v398_v33 = vmul.f32 0.03125, %v397_v32 }
 0x60f   : > { %400 = vrot.lane.b32.xlu0 %v398_v33, %s794_s29 }
 0x681   : > { %v401_v22 = vpop.permute.xlu0 %400 }
 0x682   : > { %404 = vst.msk [vmem:[%s204_s24] sm:$0x1] %vm403_vm13, %v401_v22 }
 0x683   : > { %739 = shalt.err (!%p736_p0)
}
 0x684   : > { %534 = dma.vmem_to_hbm [thread:$0]  (%p860_p11), %s417_s6, 16, %s419_s25, %s406_s7  }
 0x685 PF: > { %s430_s23 = sand.u32 1, %s770_s9   ;;  %p1034_p1 = scmp.ge.s32.totalorder %s782_s12, 2 }
 0x686   : > { %s431_s8 = scalar_lea.sflag [#allocation4], %s430_s23 }
 0x687   : > { %p544_p4 = pnand %p1034_p1, %p864_p12 }
 0x689   : > { %p545_p7 = pneg %p544_p4 }
 0x68b   : > { %765 = dma.done.wait (%p545_p7), %s431_s8, 16  }
 0x68c   : > { %767 = vsyncadd (%p545_p7), %s431_s8, 4294967280  ;;  %p18_p5 = scmp.ge.s32.totalorder %s835_s15, 4   ;;  %s1035_s9 = smov %s774_s10 }
 0x68d   : > { %s1036_s10 = smov %s778_s11  ;;  %s1037_s11 = smov %s847_s18 }
 0x68e   : > { %s1038_s12 = smov %s835_s15  ;;  %20 = sbr.rel (!%p18_p5) target bundleno = 7 (0x7), region = 86 }
 0x693   :  { %436 = vsyncpa [#allocation3], 1 }
 0x694   :  { %438 = vsyncpa [#allocation3 + $0x1], 1 }
 0x695   :  { %439 = vsyncpa [#allocation6], 1 }
 0x696   :  { %441 = vsyncpa [#allocation6 + $0x1], 1 }
 0x697   :  { %442 = vsyncpa [#allocation4], 1 }
 0x698   :  { %444 = vsyncpa [#allocation4 + $0x1], 1 }

</bundles_post_ra>
